<compile_context>
chip_gen: v5e
topology: v5e:2x2
jax: 0.10.0
libtpu: 0.0.40
codegen_flags: <defaults>
</compile_context>

<pallas_src>
import jax
import jax.numpy as jnp
from jax.experimental import pallas as pl
from jax.experimental.pallas import tpu as pltpu


ROWS_PER_STEP = 8  # sublane-aligned output block (8, latent_dim)


def _gather_rows_kernel(idx_ref, emb_ref, out_ref):
    """VMEM-resident-table path.

    idx_ref : SMEM int32 [bs_padded]            (scalar prefetch)
    emb_ref : VMEM [num_actions, latent_dim]    (whole table, constant
                                                 index_map -> DMA'd once)
    out_ref : VMEM [ROWS_PER_STEP, latent_dim]
    """
    rows = out_ref.shape[0]
    num_actions = emb_ref.shape[0]
    base = pl.program_id(0) * rows
    # Static unroll: rows is small (8). Each iteration is a dynamic-sublane
    # 1-row VMEM load + a static 1-row store; no masked partial stores on the
    # output because the block is (8, 128k)-aligned.
    for r in range(rows):
        a = idx_ref[base + r]
        # Defensive clamp (PyTorch raises on OOB; clamping avoids an OOB read).
        a = jnp.clip(a, 0, num_actions - 1)
        out_ref[pl.ds(r, 1), :] = emb_ref[pl.ds(a, 1), :]


def _row_copy_kernel(idx_ref, emb_row_ref, out_ref):
    """Large-table fallback: row selection already happened in the BlockSpec
    index_map, so the body is a plain copy."""
    del idx_ref
    out_ref[...] = emb_row_ref[...]


def embed_action(inp, action_embedding, *,
                 rows_per_step=ROWS_PER_STEP,
                 vmem_table_budget_bytes=16 * 1024 * 1024):
    """inp: [bs, k] (column 0 holds the action id). Returns [bs, latent_dim]."""
    num_actions, latent_dim = action_embedding.shape
    bs = inp.shape[0]

    # Glue for `input[:, 0].to(torch.long)` (truncates toward zero for floats).
    idx = inp[:, 0].astype(jnp.int32)  # [bs]

    table_bytes = int(num_actions) * int(latent_dim) * action_embedding.dtype.itemsize

    if table_bytes <= vmem_table_budget_bytes:
        # ---- Fast path: whole table VMEM-resident, coarse grid, in-kernel gather.
        rows = rows_per_step
        bs_pad = pl.cdiv(bs, rows) * rows
        if bs_pad != bs:
            idx = jnp.pad(idx, (0, bs_pad - bs))  # pad rows gather row 0, sliced off below

        itemsize = action_embedding.dtype.itemsize
        cost = pl.CostEstimate(
            flops=0,
            transcendentals=0,
            bytes_accessed=table_bytes + bs_pad * 4 + bs_pad * latent_dim * itemsize,
        )

        out = pl.pallas_call(
            _gather_rows_kernel,
            out_shape=jax.ShapeDtypeStruct((bs_pad, latent_dim), action_embedding.dtype),
            grid_spec=pltpu.PrefetchScalarGridSpec(
                num_scalar_prefetch=1,               # idx lands in SMEM
                grid=(bs_pad // rows,),              # ROWS_PER_STEP batch rows / step
                in_specs=[
                    # Constant block index -> the table is DMA'd once and kept
                    # VMEM-resident across all grid steps.
                    pl.BlockSpec((num_actions, latent_dim),
                                 lambda i, idx_ref: (0, 0)),
                ],
                out_specs=pl.BlockSpec((rows, latent_dim),
                                       lambda i, idx_ref: (i, 0)),
            ),
            compiler_params=pltpu.CompilerParams(
                # Tiny latency-bound steps: don't bother splitting across TCs.
                dimension_semantics=("arbitrary",),
            ),
            cost_estimate=cost,
        )(idx, action_embedding)
        return out[:bs] if bs_pad != bs else out

    # ---- Fallback: table does not fit VMEM. DMA only the selected rows via a
    # data-dependent index_map (clamp folded into the index_map), with deeper
    # buffering to hide single-row HBM latency.
    # TODO(synk): for genuinely huge tables a manual pl.ANY + make_async_copy
    # gather with 4-8 row DMAs in flight would be DMA-issue-rate bound instead.
    out = pl.pallas_call(
        _row_copy_kernel,
        out_shape=jax.ShapeDtypeStruct((bs, latent_dim), action_embedding.dtype),
        grid_spec=pltpu.PrefetchScalarGridSpec(
            num_scalar_prefetch=1,
            grid=(bs,),
            in_specs=[
                pl.BlockSpec(
                    (1, latent_dim),
                    lambda i, idx_ref: (jnp.clip(idx_ref[i], 0, num_actions - 1), 0),
                    pipeline_mode=pl.Buffered(4),
                ),
            ],
            out_specs=pl.BlockSpec((1, latent_dim), lambda i, idx_ref: (i, 0)),
        ),
        compiler_params=pltpu.CompilerParams(
            dimension_semantics=("arbitrary",),
        ),
    )(idx, action_embedding)
    return out


if __name__ == "__main__":
    num_actions = 8
    latent_dim = 128
    bs = 8

    key = jax.random.PRNGKey(0)
    k_emb, k_idx = jax.random.split(key)

    # Deterministic "randn" parameter, as in nn.Parameter(torch.randn(...)).
    action_embedding = jax.random.normal(
        k_emb, (num_actions, latent_dim), jnp.float32
    )

    # Example input: [bs, 1] action ids (stored as float, cast to long in forward).
    actions = jax.random.randint(k_idx, (bs, 1), 0, num_actions)
    inp = actions.astype(jnp.float32)

    out = embed_action(inp, action_embedding)
    out = jax.block_until_ready(out)

    # Reference check against a plain JAX gather.
    ref = action_embedding[actions[:, 0]]
    assert out.shape == (bs, latent_dim)
    assert jnp.allclose(out, ref, atol=1e-6), "mismatch vs reference gather"

    print("KERNEL_OK")
</pallas_src>

<mosaic_0001>
module attributes {stable_mosaic.version = 11 : i64} {
  func.func @_gather_rows_kernel(%arg0: i32, %arg1: memref<8xi32, #tpu.memory_space<smem>>, %arg2: memref<8x128xf32, #tpu.memory_space<vmem>>, %arg3: memref<8x128xf32, #tpu.memory_space<vmem>>) attributes {dimension_semantics = [#tpu.dimension_semantics<arbitrary>], iteration_bounds = array<i64: 1>, scalar_prefetch = 1 : i64, scratch_operands = 0 : i64, tpu.core_type = #tpu.core_type<tc>, window_params = [{pipeline_mode = #tpu.pipeline_mode<synchronous>, transform_indices = @transform_0, window_bounds = array<i64: 8, 128>}, {transform_indices = @transform_1, window_bounds = array<i64: 8, 128>}]} {
    %c8_i32 = arith.constant 8 : i32
    %0 = arith.muli %arg0, %c8_i32 : i32
    %c0_i32 = arith.constant 0 : i32
    %1 = arith.addi %0, %c0_i32 : i32
    %2 = arith.index_cast %1 : i32 to index
    %3 = memref.load %arg1[%2] : memref<8xi32, #tpu.memory_space<smem>>
    %c0_i32_0 = arith.constant 0 : i32
    %c7_i32 = arith.constant 7 : i32
    %4 = arith.maxsi %c0_i32_0, %3 : i32
    %5 = arith.minsi %c7_i32, %4 : i32
    %6 = arith.index_cast %5 : i32 to index
    %c0 = arith.constant 0 : index
    %7 = vector.load %arg2[%6, %c0] : memref<8x128xf32, #tpu.memory_space<vmem>>, vector<1x128xf32>
    %c0_1 = arith.constant 0 : index
    %c0_2 = arith.constant 0 : index
    %8 = vector.load %arg3[%c0_1, %c0_2] : memref<8x128xf32, #tpu.memory_space<vmem>>, vector<1x128xf32>
    tpu.vector_store %arg3[%c0_1, %c0_2], %7 {strides = array<i32>} : memref<8x128xf32, #tpu.memory_space<vmem>>, vector<1x128xf32>,
    %c1_i32 = arith.constant 1 : i32
    %9 = arith.addi %0, %c1_i32 : i32
    %10 = arith.index_cast %9 : i32 to index
    %11 = memref.load %arg1[%10] : memref<8xi32, #tpu.memory_space<smem>>
    %c0_i32_3 = arith.constant 0 : i32
    %c7_i32_4 = arith.constant 7 : i32
    %12 = arith.maxsi %c0_i32_3, %11 : i32
    %13 = arith.minsi %c7_i32_4, %12 : i32
    %14 = arith.index_cast %13 : i32 to index
    %c0_5 = arith.constant 0 : index
    %15 = vector.load %arg2[%14, %c0_5] : memref<8x128xf32, #tpu.memory_space<vmem>>, vector<1x128xf32>
    %c1 = arith.constant 1 : index
    %c0_6 = arith.constant 0 : index
    %16 = vector.load %arg3[%c1, %c0_6] : memref<8x128xf32, #tpu.memory_space<vmem>>, vector<1x128xf32>
    tpu.vector_store %arg3[%c1, %c0_6], %15 {strides = array<i32>} : memref<8x128xf32, #tpu.memory_space<vmem>>, vector<1x128xf32>,
    %c2_i32 = arith.constant 2 : i32
    %17 = arith.addi %0, %c2_i32 : i32
    %18 = arith.index_cast %17 : i32 to index
    %19 = memref.load %arg1[%18] : memref<8xi32, #tpu.memory_space<smem>>
    %c0_i32_7 = arith.constant 0 : i32
    %c7_i32_8 = arith.constant 7 : i32
    %20 = arith.maxsi %c0_i32_7, %19 : i32
    %21 = arith.minsi %c7_i32_8, %20 : i32
    %22 = arith.index_cast %21 : i32 to index
    %c0_9 = arith.constant 0 : index
    %23 = vector.load %arg2[%22, %c0_9] : memref<8x128xf32, #tpu.memory_space<vmem>>, vector<1x128xf32>
    %c2 = arith.constant 2 : index
    %c0_10 = arith.constant 0 : index
    %24 = vector.load %arg3[%c2, %c0_10] : memref<8x128xf32, #tpu.memory_space<vmem>>, vector<1x128xf32>
    tpu.vector_store %arg3[%c2, %c0_10], %23 {strides = array<i32>} : memref<8x128xf32, #tpu.memory_space<vmem>>, vector<1x128xf32>,
    %c3_i32 = arith.constant 3 : i32
    %25 = arith.addi %0, %c3_i32 : i32
    %26 = arith.index_cast %25 : i32 to index
    %27 = memref.load %arg1[%26] : memref<8xi32, #tpu.memory_space<smem>>
    %c0_i32_11 = arith.constant 0 : i32
    %c7_i32_12 = arith.constant 7 : i32
    %28 = arith.maxsi %c0_i32_11, %27 : i32
    %29 = arith.minsi %c7_i32_12, %28 : i32
    %30 = arith.index_cast %29 : i32 to index
    %c0_13 = arith.constant 0 : index
    %31 = vector.load %arg2[%30, %c0_13] : memref<8x128xf32, #tpu.memory_space<vmem>>, vector<1x128xf32>
    %c3 = arith.constant 3 : index
    %c0_14 = arith.constant 0 : index
    %32 = vector.load %arg3[%c3, %c0_14] : memref<8x128xf32, #tpu.memory_space<vmem>>, vector<1x128xf32>
    tpu.vector_store %arg3[%c3, %c0_14], %31 {strides = array<i32>} : memref<8x128xf32, #tpu.memory_space<vmem>>, vector<1x128xf32>,
    %c4_i32 = arith.constant 4 : i32
    %33 = arith.addi %0, %c4_i32 : i32
    %34 = arith.index_cast %33 : i32 to index
    %35 = memref.load %arg1[%34] : memref<8xi32, #tpu.memory_space<smem>>
    %c0_i32_15 = arith.constant 0 : i32
    %c7_i32_16 = arith.constant 7 : i32
    %36 = arith.maxsi %c0_i32_15, %35 : i32
    %37 = arith.minsi %c7_i32_16, %36 : i32
    %38 = arith.index_cast %37 : i32 to index
    %c0_17 = arith.constant 0 : index
    %39 = vector.load %arg2[%38, %c0_17] : memref<8x128xf32, #tpu.memory_space<vmem>>, vector<1x128xf32>
    %c4 = arith.constant 4 : index
    %c0_18 = arith.constant 0 : index
    %40 = vector.load %arg3[%c4, %c0_18] : memref<8x128xf32, #tpu.memory_space<vmem>>, vector<1x128xf32>
    tpu.vector_store %arg3[%c4, %c0_18], %39 {strides = array<i32>} : memref<8x128xf32, #tpu.memory_space<vmem>>, vector<1x128xf32>,
    %c5_i32 = arith.constant 5 : i32
    %41 = arith.addi %0, %c5_i32 : i32
    %42 = arith.index_cast %41 : i32 to index
    %43 = memref.load %arg1[%42] : memref<8xi32, #tpu.memory_space<smem>>
    %c0_i32_19 = arith.constant 0 : i32
    %c7_i32_20 = arith.constant 7 : i32
    %44 = arith.maxsi %c0_i32_19, %43 : i32
    %45 = arith.minsi %c7_i32_20, %44 : i32
    %46 = arith.index_cast %45 : i32 to index
    %c0_21 = arith.constant 0 : index
    %47 = vector.load %arg2[%46, %c0_21] : memref<8x128xf32, #tpu.memory_space<vmem>>, vector<1x128xf32>
    %c5 = arith.constant 5 : index
    %c0_22 = arith.constant 0 : index
    %48 = vector.load %arg3[%c5, %c0_22] : memref<8x128xf32, #tpu.memory_space<vmem>>, vector<1x128xf32>
    tpu.vector_store %arg3[%c5, %c0_22], %47 {strides = array<i32>} : memref<8x128xf32, #tpu.memory_space<vmem>>, vector<1x128xf32>,
    %c6_i32 = arith.constant 6 : i32
    %49 = arith.addi %0, %c6_i32 : i32
    %50 = arith.index_cast %49 : i32 to index
    %51 = memref.load %arg1[%50] : memref<8xi32, #tpu.memory_space<smem>>
    %c0_i32_23 = arith.constant 0 : i32
    %c7_i32_24 = arith.constant 7 : i32
    %52 = arith.maxsi %c0_i32_23, %51 : i32
    %53 = arith.minsi %c7_i32_24, %52 : i32
    %54 = arith.index_cast %53 : i32 to index
    %c0_25 = arith.constant 0 : index
    %55 = vector.load %arg2[%54, %c0_25] : memref<8x128xf32, #tpu.memory_space<vmem>>, vector<1x128xf32>
    %c6 = arith.constant 6 : index
    %c0_26 = arith.constant 0 : index
    %56 = vector.load %arg3[%c6, %c0_26] : memref<8x128xf32, #tpu.memory_space<vmem>>, vector<1x128xf32>
    tpu.vector_store %arg3[%c6, %c0_26], %55 {strides = array<i32>} : memref<8x128xf32, #tpu.memory_space<vmem>>, vector<1x128xf32>,
    %c7_i32_27 = arith.constant 7 : i32
    %57 = arith.addi %0, %c7_i32_27 : i32
    %58 = arith.index_cast %57 : i32 to index
    %59 = memref.load %arg1[%58] : memref<8xi32, #tpu.memory_space<smem>>
    %c0_i32_28 = arith.constant 0 : i32
    %c7_i32_29 = arith.constant 7 : i32
    %60 = arith.maxsi %c0_i32_28, %59 : i32
    %61 = arith.minsi %c7_i32_29, %60 : i32
    %62 = arith.index_cast %61 : i32 to index
    %c0_30 = arith.constant 0 : index
    %63 = vector.load %arg2[%62, %c0_30] : memref<8x128xf32, #tpu.memory_space<vmem>>, vector<1x128xf32>
    %c7 = arith.constant 7 : index
    %c0_31 = arith.constant 0 : index
    %64 = vector.load %arg3[%c7, %c0_31] : memref<8x128xf32, #tpu.memory_space<vmem>>, vector<1x128xf32>
    tpu.vector_store %arg3[%c7, %c0_31], %63 {strides = array<i32>} : memref<8x128xf32, #tpu.memory_space<vmem>>, vector<1x128xf32>,
    return
  }
  func.func @transform_0(%arg0: i32, %arg1: memref<8xi32, #tpu.memory_space<smem>>) -> (i32, i32) {
    %c0_i32 = arith.constant 0 : i32
    %c0_i32_0 = arith.constant 0 : i32
    %c0_i32_1 = arith.constant 0 : i32
    return %c0_i32, %c0_i32_0 : i32, i32
  }
  func.func @transform_1(%arg0: i32, %arg1: memref<8xi32, #tpu.memory_space<smem>>) -> (i32, i32) {
    %c0_i32 = arith.constant 0 : i32
    %c0_i32_0 = arith.constant 0 : i32
    return %arg0, %c0_i32 : i32, i32
  }
}

</mosaic_0001>

<bundles_post_ra>
// kernel: tpu_custom_call.1
= control target key start
LH: loop header
LB: loop body
LE: loop exit
PB: predicated region body
PF: predicated region fallthrough
CT: control target
= control target key end

     0   :  { %s261_s12 = smov [#allocation3]   ;;  %s298_s0 = inlined_call_operand.hbm [shape: s32[8], index: 0, kind: input, shape index: {}]   ;;  %s299_s1 = inlined_call_operand.hbm [shape: f32[8,128], index: 1, kind: input, shape index: {}]   ;;  %s300_s2 = inlined_call_operand.hbm [shape: f32[8,128], index: 2, kind: output, shape index: {}]  }
   0x1   :  { %s8_s11 = sshll.u32 %s298_s0, 4  ;;  %s9_s11 = int_to_ptr.hbm [resolvable:$true] %s8_s11 }
   0x2   :  { %11 = dma.hbm_to_smem %s9_s11, 16, %s261_s12, [#allocation2] }
   0x3   :  { %255 = dma.done.wait [#allocation2], 16 }
   0x4   :  { %256 = vsyncadd [#allocation2], 4294967280 }
   0x5   :  { %14 = sfence }
   0x6   :  { %15 = vsyncpa [#allocation5], 0 }
   0x7   :  { %16 = vsyncpa [#allocation6], 0  ;;  %s22_s15 = sshll.u32 %s299_s1, 4  ;;  %s262_s16 = smov [#allocation4]   ;;  %s23_s15 = int_to_ptr.hbm [resolvable:$true] %s22_s15 }
   0x8   :  { %s24_s17 = sshll.u32 %s262_s16, 4  ;;  %s25_s17 = int_to_ptr.vmem [resolvable:$true] %s24_s17 }
   0x9   :  { %27 = dma.hbm_to_vmem [thread:$0]  %s23_s15, 128, %s25_s17, [#allocation5]  }
   0xa   :  { %257 = dma.done.wait [#allocation5], 128  }
   0xb   :  { %258 = vsyncadd [#allocation5], 4294967168  ;;  %s33_s0 = sld [smem:[#allocation3]]  ;;  %s263_s3 = smov [#allocation7]  }
   0xc   :  { %s134_s18 = sld [smem:[#allocation3 + $0x1]]  ;;  %s109_s4 = sshll.u32 %s263_s3, 4  ;;  %s110_s4 = int_to_ptr.vmem [resolvable:$true] %s109_s4 }
   0xd   :  { %s140_s19 = sld [smem:[#allocation3 + $0x2]]  ;;  %s111_s7 = sshll.u32 %s300_s2, 4  ;;  %s112_s7 = int_to_ptr.hbm [resolvable:$true] %s111_s7 }
   0xe   :  { %s146_s20 = sld [smem:[#allocation3 + $0x3]] }
   0xf   :  { %s285_s21 = sld [smem:[#allocation3 + $0x4]] }
  0x10   :  { %s287_s22 = sld [smem:[#allocation3 + $0x5]] }
  0x11   :  { %p34_p0 = scmp.gt.s32.totalorder %s33_s0, 0  ;;  %p129_p1 = scmp.lt.s32.totalorder %s33_s0, 7 }
  0x12   :  { %p43_p2 = scmp.gt.s32.totalorder %s134_s18, 0  ;;  %p135_p3 = scmp.lt.s32.totalorder %s134_s18, 7 }
  0x13   :  { %s302_s0 = smov (!%p34_p0, %s33_s0), 0  ;;  %p52_p4 = scmp.gt.s32.totalorder %s140_s19, 0 }
  0x14   :  { %s304_s18 = smov (!%p43_p2, %s134_s18), 0  ;;  %s306_s0 = smov (!%p129_p1, %s302_s0), 7 }
  0x15   :  { %s308_s18 = smov (!%p135_p3, %s304_s18), 7  ;;  %s38_s1 = scalar_lea.vmem [#allocation4], %s306_s0 }
  0x16   :  { %v39_v0 = vld [vmem:[%s38_s1] sm:$0x1]  ;;  %p141_p5 = scmp.lt.s32.totalorder %s140_s19, 7  ;;  %s47_s23 = scalar_lea.vmem [#allocation4], %s308_s18 }
  0x17   :  { %40 = vst [vmem:[#allocation7] sm:$0x1] %v39_v0  ;;  %v48_v1 = vld [vmem:[%s47_s23] sm:$0x1]  ;;  %s310_s19 = smov (!%p52_p4, %s140_s19), 0  ;;  %p61_p6 = scmp.gt.s32.totalorder %s146_s20, 0 }
  0x18   :  { %49 = vst [vmem:[#allocation7 + $0x1] sm:$0x1] %v48_v1  ;;  %p147_p7 = scmp.lt.s32.totalorder %s146_s20, 7  ;;  %s312_s19 = smov (!%p141_p5, %s310_s19), 7 }
  0x19   :  { %s314_s20 = smov (!%p61_p6, %s146_s20), 0  ;;  %p70_p8 = scmp.gt.s32.totalorder %s285_s21, 0 }
  0x1a   :  { %s56_s24 = scalar_lea.vmem [#allocation4], %s312_s19  ;;  %s316_s20 = smov (!%p147_p7, %s314_s20), 7 }
  0x1b   :  { %v57_v2 = vld [vmem:[%s56_s24] sm:$0x1]  ;;  %s71_s25 = scalar_select %p70_p8, %s285_s21, 0 }
  0x1c   :  { %58 = vst [vmem:[#allocation7 + $0x2] sm:$0x1] %v57_v2  ;;  %p153_p9 = scmp.lt.s32.totalorder %s285_s21, 7  ;;  %s65_s26 = scalar_lea.vmem [#allocation4], %s316_s20 }
  0x1d   :  { %v66_v3 = vld [vmem:[%s65_s26] sm:$0x1]  ;;  %p79_p10 = scmp.gt.s32.totalorder %s287_s22, 0  ;;  %p159_p11 = scmp.lt.s32.totalorder %s287_s22, 7 }
  0x1e   :  { %67 = vst [vmem:[#allocation7 + $0x3] sm:$0x1] %v66_v3  ;;  %s318_s25 = smov (!%p153_p9, %s71_s25), 7  ;;  %s164_s27 = sld [smem:[#allocation3 + $0x6]] }
  0x1f   :  { %s320_s22 = smov (!%p79_p10, %s287_s22), 0  ;;  %s74_s28 = scalar_lea.vmem [#allocation4], %s318_s25 }
  0x20   :  { %v75_v4 = vld [vmem:[%s74_s28] sm:$0x1]  ;;  %s322_s22 = smov (!%p159_p11, %s320_s22), 7  ;;  %s170_s29 = sld [smem:[#allocation3 + $0x7]] }
  0x21   :  { %76 = vst [vmem:[#allocation7 + $0x4] sm:$0x1] %v75_v4  ;;  %s83_s30 = scalar_lea.vmem [#allocation4], %s322_s22 }
  0x22   :  { %v84_v5 = vld [vmem:[%s83_s30] sm:$0x1] }
  0x23   :  { %85 = vst [vmem:[#allocation7 + $0x5] sm:$0x1] %v84_v5 }
  0x24   :  { %p88_p12 = scmp.gt.s32.totalorder %s164_s27, 0  ;;  %p165_p13 = scmp.lt.s32.totalorder %s164_s27, 7 }
  0x26   :  { %s324_s27 = smov (!%p88_p12, %s164_s27), 0  ;;  %p97_p0 = scmp.gt.s32.totalorder %s170_s29, 0 }
  0x27   :  { %p171_p1 = scmp.lt.s32.totalorder %s170_s29, 7  ;;  %s326_s27 = smov (!%p165_p13, %s324_s27), 7 }
  0x28   :  { %s328_s29 = smov (!%p97_p0, %s170_s29), 0  ;;  %s92_s8 = scalar_lea.vmem [#allocation4], %s326_s27 }
  0x29   :  { %v93_v6 = vld [vmem:[%s92_s8] sm:$0x1]  ;;  %s330_s29 = smov (!%p171_p1, %s328_s29), 7 }
  0x2a   :  { %94 = vst [vmem:[#allocation7 + $0x6] sm:$0x1] %v93_v6  ;;  %s101_s9 = scalar_lea.vmem [#allocation4], %s330_s29 }
  0x2b   :  { %v102_v7 = vld [vmem:[%s101_s9] sm:$0x1] }
  0x2c   :  { %103 = vst [vmem:[#allocation7 + $0x7] sm:$0x1] %v102_v7 }
  0x2d   :  { %114 = dma.vmem_to_hbm [thread:$0]  %s110_s4, 128, %s112_s7, [#allocation6]  }
  0x2e   :  { %259 = dma.done.wait [#allocation6], 128  }
  0x2f   :  { %260 = vsyncadd [#allocation6], 4294967168 }
  0x30   :  { %119 = vsyncpa [#allocation5], 1 }
  0x31   :  { %120 = vsyncpa [#allocation6], 1 }

</bundles_post_ra>
